<compile_context>
chip_gen: v7x
topology: tpu7x:2x2x1
jax: 0.10.0
libtpu: 0.0.40
codegen_flags: <defaults>
</compile_context>

<pallas_src>
import math
import functools

import jax
import jax.numpy as jnp
from jax.experimental import pallas as pl
from jax.experimental.pallas import tpu as pltpu


def _kl_balancer_kernel_stacked(n_latents, alphas_ref, kls_ref, out_ref):
    """alphas_ref: SMEM (n_latents,) f32
       kls_ref:    VMEM (n_latents, TB, L)
       out_ref:    VMEM (TB, L)
    """
    acc = alphas_ref[0] * kls_ref[0].astype(jnp.float32)
    for i in range(1, n_latents):
        acc = acc + alphas_ref[i] * kls_ref[i].astype(jnp.float32)
    out_ref[...] = acc.astype(out_ref.dtype)


def _kl_balancer_kernel_multi(n_latents, alphas_ref, *refs):
    """alphas_ref: SMEM (n_latents,) f32
       refs:       n_latents VMEM (TB, L) inputs followed by the (TB, L) output.
    """
    kl_refs, out_ref = refs[:-1], refs[-1]
    acc = alphas_ref[0] * kl_refs[0][...].astype(jnp.float32)
    for i in range(1, n_latents):
        acc = acc + alphas_ref[i] * kl_refs[i][...].astype(jnp.float32)
    out_ref[...] = acc.astype(out_ref.dtype)


def _choose_layout(total):
    """Flatten `total` elements into a lane-dense (rows, lanes) slab.

    Returns (rows, lanes, pad) where pad is flat padding (only needed in the
    degenerate case of a huge element count with no multiple-of-128 divisor).
    """
    for w in (4096, 2048, 1024, 512, 256, 128):
        if total % w == 0:
            return total // w, w, 0
    if total <= 8 * 4096:
        # Small enough to live in a single (1, total) block (block dims equal
        # the full array dims, so no (8,128) padding constraint applies).
        return 1, total, 0
    lanes = 512
    padded = pl.cdiv(total, lanes) * lanes
    return padded // lanes, lanes, padded - total


def _choose_row_tile(rows, lanes, n_latents, in_itemsize, out_itemsize, budget):
    """Rows per block: biggest tile whose double-buffered set fits `budget`."""
    sub = {4: 8, 2: 16, 1: 32}.get(in_itemsize, 8)
    bytes_per_row = 2 * lanes * (n_latents * in_itemsize + out_itemsize)
    tb_max = max(sub, budget // max(bytes_per_row, 1))
    if rows <= tb_max:
        return rows
    return max(sub, (tb_max // sub) * sub)


def kl_balancer(log_alphas, kls, *, vmem_budget_bytes=12 * 1024 * 1024):
    """JAX/Pallas equivalent of KLBalancer.forward.

    log_alphas: (n_latents,) f32 parameter.
    kls: list/tuple of same-shaped arrays, or a stacked (n_latents, ...) array.
    Returns the alpha-weighted sum with the shape of a single KL term.
    """
    alphas = jax.nn.softmax(log_alphas.astype(jnp.float32), axis=0)

    is_list = isinstance(kls, (list, tuple))
    if is_list:
        kls = list(kls)
        n_latents = len(kls)
        kl_shape = kls[0].shape
        in_dtype = jnp.result_type(*[k.dtype for k in kls])
    else:
        n_latents = kls.shape[0]
        kl_shape = kls.shape[1:]
        in_dtype = kls.dtype
    # torch promotion: f32 alphas * kl -> at least f32 output.
    out_dtype = jnp.result_type(jnp.float32, in_dtype)

    total = math.prod(kl_shape) if kl_shape else 1
    rows, lanes, pad = _choose_layout(total)
    in_itemsize = jnp.dtype(in_dtype).itemsize
    out_itemsize = jnp.dtype(out_dtype).itemsize
    tb = _choose_row_tile(rows, lanes, n_latents, in_itemsize, out_itemsize,
                          vmem_budget_bytes)
    grid = (pl.cdiv(rows, tb),)

    alphas_spec = pl.BlockSpec(memory_space=pltpu.MemorySpace.SMEM)
    out_spec = pl.BlockSpec((tb, lanes), lambda i: (i, 0))
    out_shape = jax.ShapeDtypeStruct((rows, lanes), out_dtype)
    cparams = pltpu.CompilerParams(dimension_semantics=("parallel",))

    def to2d(term):
        flat = term.reshape(-1)
        if pad:
            flat = jnp.pad(flat, (0, pad))
        return flat.reshape(rows, lanes)

    if is_list:
        # One input per KL term: no stack copy in HBM, minimal traffic.
        kernel = functools.partial(_kl_balancer_kernel_multi, n_latents)
        in_specs = [alphas_spec] + [
            pl.BlockSpec((tb, lanes), lambda i: (i, 0))
            for _ in range(n_latents)
        ]
        args = (alphas,) + tuple(to2d(k) for k in kls)
    else:
        # Pre-stacked input: stream (n_latents, tb, lanes) tiles over rows.
        kernel = functools.partial(_kl_balancer_kernel_stacked, n_latents)
        x = kls.reshape(n_latents, -1)
        if pad:
            x = jnp.pad(x, ((0, 0), (0, pad)))
        x = x.reshape(n_latents, rows, lanes)
        in_specs = [
            alphas_spec,
            pl.BlockSpec((n_latents, tb, lanes), lambda i: (0, i, 0)),
        ]
        args = (alphas, x)

    out = pl.pallas_call(
        kernel,
        out_shape=out_shape,
        grid_spec=pltpu.PrefetchScalarGridSpec(
            num_scalar_prefetch=0,
            grid=grid,
            in_specs=in_specs,
            out_specs=out_spec,
        ),
        compiler_params=cparams,
    )(*args)

    if pad:
        out = out.reshape(-1)[:total]
    return out.reshape(kl_shape)


if __name__ == "__main__":
    n_latents = 4
    B, D = 16, 256  # each KL term is a (B, D) per-sample/per-feature map

    # Deterministic parameter init matching reset_parameters():
    #   log_alphas[i] = log(1 / (i + 1))
    log_alphas = jnp.array(
        [math.log(1.0 / (i + 1)) for i in range(n_latents)], dtype=jnp.float32
    )

    # Deterministic example KL terms.
    key = jax.random.PRNGKey(0)
    keys = jax.random.split(key, n_latents)
    kls_list = [jax.random.uniform(k, (B, D), dtype=jnp.float32) for k in keys]

    # Reference (plain JAX).
    alphas_ref = jax.nn.softmax(log_alphas, axis=0)
    ref = sum(a * kl for a, kl in zip(alphas_ref, kls_list))

    # List interface (the module's real call signature).
    out = jax.block_until_ready(kl_balancer(log_alphas, kls_list))
    assert out.shape == ref.shape, "shape mismatch vs reference (list path)"
    assert jnp.allclose(out, ref, atol=1e-5, rtol=1e-5), "mismatch (list path)"

    # Pre-stacked interface.
    out_s = jax.block_until_ready(
        kl_balancer(log_alphas, jnp.stack(kls_list, axis=0))
    )
    assert out_s.shape == ref.shape, "shape mismatch vs reference (stacked path)"
    assert jnp.allclose(out_s, ref, atol=1e-5, rtol=1e-5), "mismatch (stacked path)"

    print("KERNEL_OK")
</pallas_src>

<mosaic_0001>
module attributes {stable_mosaic.version = 11 : i64} {
  func.func @_kl_balancer_kernel_multi(%arg0: i32, %arg1: memref<4xf32, #tpu.memory_space<smem>>, %arg2: memref<1x4096xf32, #tpu.memory_space<vmem>>, %arg3: memref<1x4096xf32, #tpu.memory_space<vmem>>, %arg4: memref<1x4096xf32, #tpu.memory_space<vmem>>, %arg5: memref<1x4096xf32, #tpu.memory_space<vmem>>, %arg6: memref<1x4096xf32, #tpu.memory_space<vmem>>) attributes {dimension_semantics = [#tpu.dimension_semantics<parallel>], iteration_bounds = array<i64: 1>, scalar_prefetch = 0 : i64, scratch_operands = 0 : i64, tpu.core_type = #tpu.core_type<tc>, window_params = [{transform_indices = @transform_0, window_bounds = array<i64: 4>}, {transform_indices = @transform_1, window_bounds = array<i64: 1, 4096>}, {transform_indices = @transform_2, window_bounds = array<i64: 1, 4096>}, {transform_indices = @transform_3, window_bounds = array<i64: 1, 4096>}, {transform_indices = @transform_4, window_bounds = array<i64: 1, 4096>}, {transform_indices = @transform_5, window_bounds = array<i64: 1, 4096>}]} {
    %c0 = arith.constant 0 : index
    %0 = memref.load %arg1[%c0] : memref<4xf32, #tpu.memory_space<smem>>
    %c0_0 = arith.constant 0 : index
    %c0_1 = arith.constant 0 : index
    %1 = vector.load %arg2[%c0_0, %c0_1] : memref<1x4096xf32, #tpu.memory_space<vmem>>, vector<1x4096xf32>
    %2 = vector.broadcast %0 : f32 to vector<1x4096xf32>
    %3 = arith.mulf %2, %1 : vector<1x4096xf32>
    %c1 = arith.constant 1 : index
    %4 = memref.load %arg1[%c1] : memref<4xf32, #tpu.memory_space<smem>>
    %c0_2 = arith.constant 0 : index
    %c0_3 = arith.constant 0 : index
    %5 = vector.load %arg3[%c0_2, %c0_3] : memref<1x4096xf32, #tpu.memory_space<vmem>>, vector<1x4096xf32>
    %6 = vector.broadcast %4 : f32 to vector<1x4096xf32>
    %7 = arith.mulf %6, %5 : vector<1x4096xf32>
    %8 = arith.addf %3, %7 : vector<1x4096xf32>
    %c2 = arith.constant 2 : index
    %9 = memref.load %arg1[%c2] : memref<4xf32, #tpu.memory_space<smem>>
    %c0_4 = arith.constant 0 : index
    %c0_5 = arith.constant 0 : index
    %10 = vector.load %arg4[%c0_4, %c0_5] : memref<1x4096xf32, #tpu.memory_space<vmem>>, vector<1x4096xf32>
    %11 = vector.broadcast %9 : f32 to vector<1x4096xf32>
    %12 = arith.mulf %11, %10 : vector<1x4096xf32>
    %13 = arith.addf %8, %12 : vector<1x4096xf32>
    %c3 = arith.constant 3 : index
    %14 = memref.load %arg1[%c3] : memref<4xf32, #tpu.memory_space<smem>>
    %c0_6 = arith.constant 0 : index
    %c0_7 = arith.constant 0 : index
    %15 = vector.load %arg5[%c0_6, %c0_7] : memref<1x4096xf32, #tpu.memory_space<vmem>>, vector<1x4096xf32>
    %16 = vector.broadcast %14 : f32 to vector<1x4096xf32>
    %17 = arith.mulf %16, %15 : vector<1x4096xf32>
    %18 = arith.addf %13, %17 : vector<1x4096xf32>
    %c0_8 = arith.constant 0 : index
    %c0_9 = arith.constant 0 : index
    %19 = vector.load %arg6[%c0_8, %c0_9] : memref<1x4096xf32, #tpu.memory_space<vmem>>, vector<1x4096xf32>
    tpu.vector_store %arg6[%c0_8, %c0_9], %18 {strides = array<i32>} : memref<1x4096xf32, #tpu.memory_space<vmem>>, vector<1x4096xf32>,
    return
  }
  func.func @transform_0(%arg0: i32) -> i32 {
    %c0_i32 = arith.constant 0 : i32
    %c0_i32_0 = arith.constant 0 : i32
    return %c0_i32 : i32
  }
  func.func @transform_1(%arg0: i32) -> (i32, i32) {
    %c0_i32 = arith.constant 0 : i32
    %c0_i32_0 = arith.constant 0 : i32
    return %arg0, %c0_i32 : i32, i32
  }
  func.func @transform_2(%arg0: i32) -> (i32, i32) {
    %c0_i32 = arith.constant 0 : i32
    %c0_i32_0 = arith.constant 0 : i32
    return %arg0, %c0_i32 : i32, i32
  }
  func.func @transform_3(%arg0: i32) -> (i32, i32) {
    %c0_i32 = arith.constant 0 : i32
    %c0_i32_0 = arith.constant 0 : i32
    return %arg0, %c0_i32 : i32, i32
  }
  func.func @transform_4(%arg0: i32) -> (i32, i32) {
    %c0_i32 = arith.constant 0 : i32
    %c0_i32_0 = arith.constant 0 : i32
    return %arg0, %c0_i32 : i32, i32
  }
  func.func @transform_5(%arg0: i32) -> (i32, i32) {
    %c0_i32 = arith.constant 0 : i32
    %c0_i32_0 = arith.constant 0 : i32
    return %arg0, %c0_i32 : i32, i32
  }
}

</mosaic_0001>

<bundles_post_ra>
// kernel: tpu_custom_call.1
= control target key start
LH: loop header
LB: loop body
LE: loop exit
PB: predicated region body
PF: predicated region fallthrough
CT: control target
= control target key end

     0   :  { %10 = vsyncpa [#allocation5], 0  ;;  %s400_s0 = inlined_call_operand.hbm [shape: f32[4], index: 0, kind: input, shape index: {}]   ;;  %s401_s1 = inlined_call_operand.hbm [shape: f32[1,4096], index: 1, kind: input, shape index: {}]   ;;  %s402_s2 = inlined_call_operand.hbm [shape: f32[1,4096], index: 2, kind: input, shape index: {}]   ;;  %s403_s3 = inlined_call_operand.hbm [shape: f32[1,4096], index: 3, kind: input, shape index: {}]   ;;  %s404_s4 = inlined_call_operand.hbm [shape: f32[1,4096], index: 4, kind: input, shape index: {}]   ;;  %s405_s5 = inlined_call_operand.hbm [shape: f32[1,4096], index: 5, kind: output, shape index: {}]  }
   0x1   :  { %11 = vsyncpa [#allocation3], 0 }
   0x2   :  { %12 = vsyncpa [#allocation8], 0 }
   0x3   :  { %13 = vsyncpa [#allocation11], 0 }
   0x4   :  { %14 = vsyncpa [#allocation4], 0  ;;  %s292_s18 = smov [#allocation7]   ;;  %s293_s20 = smov [#allocation6]  }
   0x5   :  { %s39_s19 = sshll.u32 %s292_s18, 4  ;;  %s29_s21 = sshll.u32 %s293_s20, 4  ;;  %s40_s19 = int_to_ptr.vmem [resolvable:$true] %s39_s19  ;;  %s30_s21 = int_to_ptr.vmem [resolvable:$true] %s29_s21 }
   0x6   :  { %s162_s24 = scalar_lea.hbm %s402_s2, 512 }
   0x7   :  { %p163_p0 = scmp.ne.s32.totalorder %s402_s2, %s162_s24  ;;  %p166_p1 = scmp.lt.u32.totalorder %s162_s24, %s402_s2 }
   0x9   :  { %p168_p2 = pnand %p166_p1, %p163_p0 }
   0xb   :  { %171 = shalt.err (!%p168_p2)
}
   0xc   :  { %s172_s29 = scalar_lea.vmem %s40_s19, 512  ;;  %p177_p4 = scmp.lt.s32.totalorder %s40_s19, %s40_s19 }
   0xd   :  { %p173_p3 = scmp.ne.s32.totalorder %s40_s19, %s172_s29  ;;  %p178_p5 = scmp.lt.s32.totalorder %s172_s29, %s172_s29 }
   0xf   :  { %p179_p6 = por %p178_p5, %p177_p4 }
  0x11   :  { %p180_p7 = pnand %p179_p6, %p173_p3 }
  0x13   :  { %183 = shalt.err (!%p180_p7)
}
  0x14   :  { %42 = dma.hbm_to_vmem [thread:$0]  %s402_s2, 512, %s40_s19, [#allocation8]  }
  0x15   :  { %s184_s9 = scalar_lea.hbm %s400_s0, 16 }
  0x16   :  { %p185_p8 = scmp.ne.s32.totalorder %s400_s0, %s184_s9  ;;  %p188_p9 = scmp.lt.u32.totalorder %s184_s9, %s400_s0 }
  0x18   :  { %p190_p10 = pnand %p188_p9, %p185_p8 }
  0x1a   :  { %193 = shalt.err (!%p190_p10)
}
  0x1b   :  { %s294_s14 = smov [#allocation2]   ;;  %s194_s18 = scalar_lea.hbm %s401_s1, 512 }
  0x1c   :  { %22 = dma.hbm_to_smem %s400_s0, 16, %s294_s14, [#allocation5]  }
  0x1d   :  { %p195_p11 = scmp.ne.s32.totalorder %s401_s1, %s194_s18  ;;  %p198_p12 = scmp.lt.u32.totalorder %s194_s18, %s401_s1 }
  0x1f   :  { %p200_p13 = pnand %p198_p12, %p195_p11 }
  0x21   :  { %203 = shalt.err (!%p200_p13)
}
  0x22   :  { %s204_s24 = scalar_lea.vmem %s30_s21, 512  ;;  %p209_p1 = scmp.lt.s32.totalorder %s30_s21, %s30_s21 }
  0x23   :  { %p205_p0 = scmp.ne.s32.totalorder %s30_s21, %s204_s24  ;;  %p210_p2 = scmp.lt.s32.totalorder %s204_s24, %s204_s24 }
  0x25   :  { %p211_p3 = por %p210_p2, %p209_p1 }
  0x27   :  { %p212_p4 = pnand %p211_p3, %p205_p0 }
  0x29   :  { %215 = shalt.err (!%p212_p4)
}
  0x2a   :  { %32 = dma.hbm_to_vmem [thread:$0]  %s401_s1, 512, %s30_s21, [#allocation3]  }
  0x2b   :  { %s295_s26 = smov [#allocation9]   ;;  %s296_s28 = smov [#allocation10]  }
  0x2c   :  { %s49_s27 = sshll.u32 %s295_s26, 4  ;;  %s59_s29 = sshll.u32 %s296_s28, 4  ;;  %s50_s27 = int_to_ptr.vmem [resolvable:$true] %s49_s27  ;;  %s60_s29 = int_to_ptr.vmem [resolvable:$true] %s59_s29 }
  0x2d   :  { %s216_s7 = scalar_lea.hbm %s403_s3, 512 }
  0x2e   :  { %p217_p5 = scmp.ne.s32.totalorder %s403_s3, %s216_s7  ;;  %p220_p6 = scmp.lt.u32.totalorder %s216_s7, %s403_s3 }
  0x30   :  { %p222_p7 = pnand %p220_p6, %p217_p5 }
  0x32   :  { %225 = shalt.err (!%p222_p7)
}
  0x33   :  { %s226_s1 = scalar_lea.vmem %s50_s27, 512  ;;  %p231_p9 = scmp.lt.s32.totalorder %s50_s27, %s50_s27 }
  0x34   :  { %p227_p8 = scmp.ne.s32.totalorder %s50_s27, %s226_s1  ;;  %p232_p10 = scmp.lt.s32.totalorder %s226_s1, %s226_s1 }
  0x36   :  { %p233_p11 = por %p232_p10, %p231_p9 }
  0x38   :  { %p234_p12 = pnand %p233_p11, %p227_p8 }
  0x3a   :  { %237 = shalt.err (!%p234_p12)
}
  0x3b   :  { %52 = dma.hbm_to_vmem [thread:$0]  %s403_s3, 512, %s50_s27, [#allocation8]  }
  0x3c   :  { %s238_s15 = scalar_lea.hbm %s404_s4, 512 }
  0x3d   :  { %p239_p13 = scmp.ne.s32.totalorder %s404_s4, %s238_s15  ;;  %p242_p0 = scmp.lt.u32.totalorder %s238_s15, %s404_s4 }
  0x3f   :  { %p244_p1 = pnand %p242_p0, %p239_p13 }
  0x41   :  { %247 = shalt.err (!%p244_p1)
}
  0x42   :  { %s248_s19 = scalar_lea.vmem %s60_s29, 512  ;;  %p253_p3 = scmp.lt.s32.totalorder %s60_s29, %s60_s29 }
  0x43   :  { %p249_p2 = scmp.ne.s32.totalorder %s60_s29, %s248_s19  ;;  %p254_p4 = scmp.lt.s32.totalorder %s248_s19, %s248_s19 }
  0x45   :  { %p255_p5 = por %p254_p4, %p253_p3 }
  0x47   :  { %p256_p6 = pnand %p255_p5, %p249_p2 }
  0x49   :  { %259 = shalt.err (!%p256_p6)
}
  0x4a   :  { %62 = dma.hbm_to_vmem [thread:$0]  %s404_s4, 512, %s60_s29, [#allocation11]  }
  0x4b   :  { %282 = dma.done.wait [#allocation5], 16  }
  0x4c   :  { %283 = vsyncadd [#allocation5], 4294967280 }
  0x4d   :  { %284 = dma.done.wait [#allocation3], 512  }
  0x4e   :  { %285 = vsyncadd [#allocation3], 4294966784 }
  0x4f   :  { %286 = dma.done.wait [#allocation8], 1024  }
  0x50   :  { %287 = vsyncadd [#allocation8], 4294966272 }
  0x51   :  { %288 = dma.done.wait [#allocation11], 512  }
  0x52   :  { %289 = vsyncadd [#allocation11], 4294966784 }
  0x53   :  { %78 = sfence }
  0x54   :  { %s79_s22 = sld [smem:[#allocation2]]  ;;  %s153_s23 = sld [smem:[#allocation2 + $0x1]]  ;;  %v80_v0 = vld [vmem:[#allocation6] sm:$0xff]  ;;  %v81_v3 = vld [vmem:[#allocation6 + $0x8] sm:$0xff]  ;;  %v82_v9 = vld [vmem:[#allocation6 + $0x10] sm:$0xff] }
  0x55   :  { %s154_s24 = sld [smem:[#allocation2 + $0x2]]  ;;  %s155_s0 = sld [smem:[#allocation2 + $0x3]]  ;;  %v90_v1 = vld [vmem:[#allocation7] sm:$0xff]  ;;  %v91_v4 = vld [vmem:[#allocation7 + $0x8] sm:$0xff]  ;;  %v92_v15 = vld [vmem:[#allocation7 + $0x10] sm:$0xff] }
  0x56   :  { %v104_v2 = vld [vmem:[#allocation9] sm:$0xff]  ;;  %v105_v8 = vld [vmem:[#allocation9 + $0x8] sm:$0xff]  ;;  %v106_v16 = vld [vmem:[#allocation9 + $0x10] sm:$0xff]  ;;  %s297_s4 = smov [#allocation12]  }
  0x57   :  { %v118_v7 = vld [vmem:[#allocation10] sm:$0xff]  ;;  %v119_v14 = vld [vmem:[#allocation10 + $0x8] sm:$0xff]  ;;  %v83_v20 = vld [vmem:[#allocation6 + $0x18] sm:$0xff]  ;;  %s141_s25 = sshll.u32 %s297_s4, 4  ;;  %s142_s25 = int_to_ptr.vmem [resolvable:$true] %s141_s25 }
  0x58   :  { %v93_v21 = vld [vmem:[#allocation7 + $0x18] sm:$0xff]  ;;  %v120_v27 = vld [vmem:[#allocation10 + $0x10] sm:$0xff]  ;;  %s260_s26 = scalar_lea.vmem %s142_s25, 512  ;;  %p265_p8 = scmp.lt.s32.totalorder %s142_s25, %s142_s25 }
  0x59   :  { %v107_v22 = vld [vmem:[#allocation9 + $0x18] sm:$0xff]  ;;  %p261_p7 = scmp.ne.s32.totalorder %s142_s25, %s260_s26  ;;  %p266_p9 = scmp.lt.s32.totalorder %s260_s26, %s260_s26 }
  0x5a   :  { %v84_v5 = vstv %s79_s22  ;;  %v94_v6 = vstv %s153_s23  ;;  %v121_v32 = vld [vmem:[#allocation10 + $0x18] sm:$0xff] }
  0x5b   :  { %v85_v10 = vmul.f32 %v84_v5, %v80_v0  ;;  %v95_v11 = vmul.f32 %v94_v6, %v90_v1  ;;  %v108_v12 = vstv %s154_s24  ;;  %v122_v13 = vstv %s155_s0  ;;  %p267_p10 = por %p266_p9, %p265_p8 }
  0x5c   :  { %v109_v17 = vmul.f32 %v108_v12, %v104_v2  ;;  %v86_v18 = vmul.f32 %v84_v5, %v81_v3  ;;  %v96_v19 = vmul.f32 %v94_v6, %v91_v4  ;;  %v123_v24 = vmul.f32 %v122_v13, %v118_v7 }
  0x5d   :  { %v99_v23 = vadd.f32 %v95_v11, %v85_v10  ;;  %v110_v25 = vmul.f32 %v108_v12, %v105_v8  ;;  %v87_v26 = vmul.f32 %v84_v5, %v82_v9  ;;  %v124_v29 = vmul.f32 %v122_v13, %v119_v14  ;;  %p268_p11 = pnand %p267_p10, %p261_p7 }
  0x5e   :  { %v100_v28 = vadd.f32 %v96_v19, %v86_v18  ;;  %v97_v30 = vmul.f32 %v94_v6, %v92_v15  ;;  %v111_v31 = vmul.f32 %v108_v12, %v106_v16  ;;  %v88_v34 = vmul.f32 %v84_v5, %v83_v20 }
  0x5f   :  { %v113_v33 = vadd.f32 %v109_v17, %v99_v23  ;;  %v98_v35 = vmul.f32 %v94_v6, %v93_v21  ;;  %v112_v36 = vmul.f32 %v108_v12, %v107_v22  ;;  %v125_v39 = vmul.f32 %v122_v13, %v120_v27 }
  0x60   :  { %v114_v37 = vadd.f32 %v110_v25, %v100_v28  ;;  %v101_v38 = vadd.f32 %v97_v30, %v87_v26  ;;  %v126_v42 = vmul.f32 %v122_v13, %v121_v32 }
  0x61   :  { %v127_v40 = vadd.f32 %v123_v24, %v113_v33  ;;  %v102_v41 = vadd.f32 %v98_v35, %v88_v34 }
  0x62   :  { %v128_v43 = vadd.f32 %v124_v29, %v114_v37  ;;  %v115_v44 = vadd.f32 %v111_v31, %v101_v38 }
  0x63   :  { %131 = vst [vmem:[#allocation12] sm:$0xff] %v127_v40  ;;  %v116_v45 = vadd.f32 %v112_v36, %v102_v41 }
  0x64   :  { %132 = vst [vmem:[#allocation12 + $0x8] sm:$0xff] %v128_v43  ;;  %v129_v46 = vadd.f32 %v125_v39, %v115_v44 }
  0x65   :  { %v130_v47 = vadd.f32 %v126_v42, %v116_v45 }
  0x66   :  { %133 = vst [vmem:[#allocation12 + $0x10] sm:$0xff] %v129_v46 }
  0x67   :  { %134 = vst [vmem:[#allocation12 + $0x18] sm:$0xff] %v130_v47 }
  0x68   :  { %271 = shalt.err (!%p268_p11)
}
  0x69   :  { %s272_s29 = scalar_lea.hbm %s405_s5, 512 }
  0x6a   :  { %p273_p12 = scmp.ne.s32.totalorder %s405_s5, %s272_s29  ;;  %p276_p13 = scmp.lt.u32.totalorder %s272_s29, %s405_s5 }
  0x6c   :  { %p278_p0 = pnand %p276_p13, %p273_p12 }
  0x6e   :  { %281 = shalt.err (!%p278_p0)
}
  0x6f   :  { %144 = dma.vmem_to_hbm [thread:$0]  %s142_s25, 512, %s405_s5, [#allocation4]  }
  0x70   :  { %290 = dma.done.wait [#allocation4], 512  }
  0x71   :  { %291 = vsyncadd [#allocation4], 4294966784 }
  0x72   :  { %148 = vsyncpa [#allocation3], 1 }
  0x73   :  { %149 = vsyncpa [#allocation8], 1 }
  0x74   :  { %150 = vsyncpa [#allocation11], 1 }
  0x75   :  { %151 = vsyncpa [#allocation4], 1 }
  0x76   :  { %152 = vsyncpa [#allocation5], 1 }

</bundles_post_ra>
